<compile_context>
chip_gen: v7x
topology: tpu7x:2x2x1
jax: 0.10.0
libtpu: 0.0.40
codegen_flags: <defaults>
</compile_context>

<pallas_src>
import math
import numpy as np
import jax
import jax.numpy as jnp
from jax.experimental import pallas as pl
from jax.experimental.pallas import tpu as pltpu


# ----------------------------------------------------------------------------
# Kernel 1: region -> object (online softmax over all connected pixels)
# ----------------------------------------------------------------------------
def _r2o_kernel(a_ref,          # [No_pad, dhr]  cdt   (q @ W_reg^T, scale folded)
                c_ref,          # [No_pad, 1]    f32   (q @ b_reg^T, scale folded)
                conn_ref,       # [No_pad, Nr]   f32   connectivity (object x region)
                feat_reg_ref,   # [dhr, Tp]      cdt   current region pixel tile
                feat_obj_ref,   # [No_pad, dho]  f32   residual input
                w_tr2o_ref,     # [dhr, dho]     cdt
                b_tr2o_ref,     # [1, dho]       f32
                out_obj_ref,    # [No_pad, dho]  f32   (revisited; written on last step)
                m_sc, l_sc, acc_sc):
    f32 = jnp.float32
    cdt = feat_reg_ref.dtype
    r = pl.program_id(0)
    t = pl.program_id(1)
    neg = jnp.float32(-1e30)

    @pl.when((r == 0) & (t == 0))
    def _():
        m_sc[...] = jnp.full_like(m_sc, neg)
        l_sc[...] = jnp.zeros_like(l_sc)
        acc_sc[...] = jnp.zeros_like(acc_sc)

    feat_reg = feat_reg_ref[...]                                   # [dhr, Tp]
    relu_reg = jnp.maximum(feat_reg, jnp.zeros((), cdt))

    # scores[i, p] = a_i . relu(x_p) + c_i      (lane-dense in pixels)
    scores = jnp.dot(a_ref[...], relu_reg, preferred_element_type=f32) + c_ref[...]

    # connectivity column for this region: one vreg iota-select, no mask matmuls
    lane = jax.lax.broadcasted_iota(jnp.int32, conn_ref.shape, 1)
    col = jnp.sum(jnp.where(lane == r, conn_ref[...], 0.0), axis=1, keepdims=True)
    mask = col > 0.5                                               # [No_pad, 1]

    s = jnp.where(mask, scores, neg)
    m_new = jnp.maximum(m_sc[...], jnp.max(s, axis=1, keepdims=True))
    alpha = jnp.exp(m_sc[...] - m_new)
    p = jnp.where(mask, jnp.exp(s - m_new), 0.0)                   # [No_pad, Tp]
    l_sc[...] = alpha * l_sc[...] + jnp.sum(p, axis=1, keepdims=True)
    acc_sc[...] = alpha * acc_sc[...] + jax.lax.dot_general(
        p.astype(cdt), feat_reg, (((1,), (1,)), ((), ())),
        preferred_element_type=f32)                                # [No_pad, dhr]
    m_sc[...] = m_new

    @pl.when((r == pl.num_programs(0) - 1) & (t == pl.num_programs(1) - 1))
    def _():
        msg = acc_sc[...] / jnp.maximum(l_sc[...], 1e-30)          # exact (done once)
        upd = jnp.dot(jnp.maximum(msg, 0.0).astype(cdt), w_tr2o_ref[...],
                      preferred_element_type=f32) + b_tr2o_ref[...]
        out_obj_ref[...] = feat_obj_ref[...] + upd


# ----------------------------------------------------------------------------
# Kernel 2: object -> region (per-pixel softmax over connected objects)
# ----------------------------------------------------------------------------
def _o2r_kernel(a_ref,          # [No_pad, dhr]  cdt
                c_ref,          # [No_pad, 1]    f32
                conn_ref,       # [No_pad, Nr]   f32   connectivity (object x region)^T form
                feat_objT_ref,  # [dho, No_pad]  cdt   raw object features (transposed)
                w_to2rT_ref,    # [dhr, dho]     cdt
                b_to2r_ref,     # [dhr, 1]       f32
                feat_reg_ref,   # [dhr, Tp]      cdt
                out_reg_ref):   # [dhr, Tp]      out dtype
    f32 = jnp.float32
    cdt = feat_reg_ref.dtype
    r = pl.program_id(0)
    neg = jnp.float32(-1e30)

    feat_reg = feat_reg_ref[...]                                   # [dhr, Tp]
    relu_reg = jnp.maximum(feat_reg, jnp.zeros((), cdt))
    scores = jnp.dot(a_ref[...], relu_reg, preferred_element_type=f32) + c_ref[...]

    lane = jax.lax.broadcasted_iota(jnp.int32, conn_ref.shape, 1)
    col = jnp.sum(jnp.where(lane == r, conn_ref[...], 0.0), axis=1, keepdims=True)
    mask = col > 0.5                                               # [No_pad, 1]

    s = jnp.where(mask, scores, neg)
    m = jnp.max(s, axis=0, keepdims=True)                          # sublane reduce, [1, Tp]
    p = jnp.where(mask, jnp.exp(s - m), 0.0)                       # [No_pad, Tp]
    denom = jnp.maximum(jnp.sum(p, axis=0, keepdims=True), 1e-30)
    prob = p * pl.reciprocal(denom)                                # exact reciprocal

    # msg[:, p] = sum_j prob[j, p] * feat_obj[j, :]
    msg = jnp.dot(feat_objT_ref[...], prob.astype(cdt),
                  preferred_element_type=f32)                      # [dho, Tp]
    upd = jnp.dot(w_to2rT_ref[...], jnp.maximum(msg, 0.0).astype(cdt),
                  preferred_element_type=f32) + b_to2r_ref[...]    # [dhr, Tp]
    out_reg_ref[...] = (feat_reg.astype(f32) + upd).astype(out_reg_ref.dtype)


# ----------------------------------------------------------------------------
# Wrapper
# ----------------------------------------------------------------------------
def _choose_pixel_tile(hw, dhr, itemsize, cap=1024):
    """Largest lane-legal pixel tile: hw itself if small, else a 128-aligned divisor <= cap."""
    if hw <= cap:
        return hw
    t = cap - (cap % 128)
    while t >= 128:
        if hw % t == 0:
            return t
        t -= 128
    # no 128-aligned divisor: only lane-legal choice is the full row; refuse if it is huge
    if hw * dhr * (itemsize + 4) * 4 > (48 << 20):
        raise ValueError(
            f"H*W={hw} has no 128-aligned divisor <= {cap}; pass tile_pixels explicitly "
            "or pad the spatial dims.")
    return hw


def _vmem_limit(pipelined_block_bytes):
    est = 2 * pipelined_block_bytes + (4 << 20)     # double-buffered blocks + weights/scratch
    return int(min(max(est, 16 << 20), 100 << 20))


def factor_updating_structure_forward(feature_obj, feature_region, mat_object, mat_region,
                                      params, *, compute_dtype=jnp.bfloat16,
                                      tile_pixels=None, region_out_dtype=jnp.float32):
    """feature_obj: [No, dho]; feature_region: NCHW [Nr, dhr, H, W];
       mat_object: [No, Nr]; mat_region: [Nr, No]."""
    f32 = jnp.float32
    cdt = compute_dtype
    No, dho = feature_obj.shape
    Nr, dhr, H, W = feature_region.shape
    HW = H * W
    dmm = params['w_ar2o_obj'].shape[1]
    scale = jnp.float32(1.0 / math.sqrt(dmm + 1e-10))
    No_pad = ((No + 7) // 8) * 8

    # ---- tiny object-side work, hoisted once (wrapper) ----------------------
    feat_obj = feature_obj.astype(f32)
    relu_obj = jnp.maximum(feat_obj, 0.0)
    q_r2o = (relu_obj @ params['w_ar2o_obj'].astype(f32)
             + params['b_ar2o_obj'].astype(f32)) * scale           # [No, dmm]
    q_o2r = (relu_obj @ params['w_ao2r_obj'].astype(f32)
             + params['b_ao2r_obj'].astype(f32)) * scale
    # fold the region-side projection into per-object query rows:
    a_r2o = q_r2o @ params['w_ar2o_reg'].astype(f32).T             # [No, dhr]
    c_r2o = q_r2o @ params['b_ar2o_reg'].astype(f32).T             # [No, 1]
    a_o2r = q_o2r @ params['w_ao2r_reg'].astype(f32).T
    c_o2r = q_o2r @ params['b_ao2r_reg'].astype(f32).T

    def pad_rows(x, rows):
        return jnp.zeros((rows,) + x.shape[1:], x.dtype).at[:x.shape[0]].set(x)

    a_r2o = pad_rows(a_r2o, No_pad).astype(cdt)
    c_r2o = pad_rows(c_r2o, No_pad)
    a_o2r = pad_rows(a_o2r, No_pad).astype(cdt)
    c_o2r = pad_rows(c_o2r, No_pad)
    feat_obj_pad = pad_rows(feat_obj, No_pad)                      # f32 residual input
    feat_objT = feat_obj_pad.T.astype(cdt)                         # [dho, No_pad]

    conn_r2o = pad_rows((mat_object > 0).astype(f32), No_pad)      # [No_pad, Nr]
    conn_o2r = pad_rows((mat_region > 0).astype(f32).T, No_pad)    # [No_pad, Nr]

    w_tr2o = params['w_tr2o'].astype(cdt)                          # [dhr, dho]
    b_tr2o = params['b_tr2o'].astype(f32)                          # [1, dho]
    w_to2rT = params['w_to2r'].astype(cdt).T                       # [dhr, dho]
    b_to2r = params['b_to2r'].astype(f32).T                        # [dhr, 1]

    # channels-first, spatially flattened region features (free reshape, no transpose)
    feat_reg = feature_region.reshape(Nr, dhr, HW).astype(cdt)

    csz = jnp.dtype(cdt).itemsize
    osz = jnp.dtype(region_out_dtype).itemsize
    if tile_pixels is None:
        Tp = _choose_pixel_tile(HW, dhr, csz)
    else:
        Tp = int(tile_pixels)
    assert HW % Tp == 0, "tile_pixels must divide H*W"
    n_pt = HW // Tp

    def full(shape):
        return pl.BlockSpec(shape, lambda r, t: (0,) * len(shape))
    reg_spec = pl.BlockSpec((None, dhr, Tp), lambda r, t: (r, 0, t))

    # ---- kernel 1: region -> object -----------------------------------------
    out_obj_pad = pl.pallas_call(
        _r2o_kernel,
        out_shape=jax.ShapeDtypeStruct((No_pad, dho), f32),
        grid_spec=pltpu.PrefetchScalarGridSpec(
            num_scalar_prefetch=0,
            grid=(Nr, n_pt),
            in_specs=[full((No_pad, dhr)), full((No_pad, 1)), full((No_pad, Nr)),
                      reg_spec,
                      full((No_pad, dho)), full((dhr, dho)), full((1, dho))],
            out_specs=full((No_pad, dho)),
            scratch_shapes=[pltpu.VMEM((No_pad, 1), f32),      # running max
                            pltpu.VMEM((No_pad, 1), f32),      # running sum
                            pltpu.VMEM((No_pad, dhr), f32)]),  # running weighted acc
        compiler_params=pltpu.CompilerParams(
            dimension_semantics=("arbitrary", "arbitrary"),
            vmem_limit_bytes=_vmem_limit(dhr * Tp * csz)),
    )(a_r2o, c_r2o, conn_r2o, feat_reg, feat_obj_pad, w_tr2o, b_tr2o)

    # ---- kernel 2: object -> region (fully parallel grid) -------------------
    out_reg_flat = pl.pallas_call(
        _o2r_kernel,
        out_shape=jax.ShapeDtypeStruct((Nr, dhr, HW), region_out_dtype),
        grid_spec=pltpu.PrefetchScalarGridSpec(
            num_scalar_prefetch=0,
            grid=(Nr, n_pt),
            in_specs=[full((No_pad, dhr)), full((No_pad, 1)), full((No_pad, Nr)),
                      full((dho, No_pad)), full((dhr, dho)), full((dhr, 1)),
                      reg_spec],
            out_specs=pl.BlockSpec((None, dhr, Tp), lambda r, t: (r, 0, t))),
        compiler_params=pltpu.CompilerParams(
            dimension_semantics=("parallel", "parallel"),
            vmem_limit_bytes=_vmem_limit(dhr * Tp * (csz + osz))),
    )(a_o2r, c_o2r, conn_o2r, feat_objT, w_to2rT, b_to2r, feat_reg)

    out_obj = out_obj_pad[:No]
    out_reg = out_reg_flat.reshape(Nr, dhr, H, W)                  # contiguous reshape
    return out_obj, out_reg


# ----------------------------------------------------------------------------
# Pure-numpy reference (mirrors the PyTorch per-item loop semantics)
# ----------------------------------------------------------------------------
def _ref_forward(feature_obj, feature_region, mat_object, mat_region, P):
    fo = np.asarray(feature_obj, np.float32)
    fr = np.asarray(feature_region, np.float32)           # NCHW
    mo = np.asarray(mat_object); mr = np.asarray(mat_region)
    P = {k: np.asarray(v, np.float32) for k, v in P.items()}

    def lin(x, w, b):
        return np.maximum(x, 0.0) @ w + b

    No, dho = fo.shape
    Nr, dhr, H, W = fr.shape
    dmm = P['w_ar2o_obj'].shape[1]
    scale = 1.0 / np.sqrt(dmm + 1e-10)
    reg_cl = fr.transpose(0, 2, 3, 1)                      # [Nr,H,W,dhr]

    # region -> object
    obj_att = lin(fo, P['w_ar2o_obj'], P['b_ar2o_obj'])
    reg_att = lin(reg_cl.reshape(-1, dhr), P['w_ar2o_reg'],
                  P['b_ar2o_reg']).reshape(Nr, H, W, dmm)
    msg_obj = np.zeros((No, dhr), np.float32)
    for i in range(No):
        sel = np.where(mo[i] > 0)[0]
        q = reg_att[sel].reshape(-1, dmm)
        feats = reg_cl[sel].reshape(-1, dhr)
        sim = (q @ obj_att[i].reshape(dmm)) * scale
        e = np.exp(sim - sim.max()); prob = e / e.sum()
        msg_obj[i] = (feats * prob[:, None]).sum(0)
    out_obj = fo + lin(msg_obj, P['w_tr2o'], P['b_tr2o'])

    # object -> region
    reg_att2 = lin(reg_cl.reshape(-1, dhr), P['w_ao2r_reg'],
                   P['b_ao2r_reg']).reshape(Nr, H, W, dmm)
    obj_att2 = lin(fo, P['w_ao2r_obj'], P['b_ao2r_obj'])
    msg_reg = np.zeros((Nr, H, W, dho), np.float32)
    for r in range(Nr):
        sel = np.where(mr[r] > 0)[0]
        sim = np.einsum('kc,hwc->khw', obj_att2[sel], reg_att2[r]) * scale
        sim = sim - sim.max(0, keepdims=True)
        e = np.exp(sim); prob = e / e.sum(0, keepdims=True)
        msg_reg[r] = np.einsum('khw,kc->hwc', prob, fo[sel])
    out_reg = reg_cl + lin(msg_reg.reshape(-1, dho), P['w_to2r'],
                           P['b_to2r']).reshape(Nr, H, W, dhr)
    return out_obj, out_reg.transpose(0, 3, 1, 2)


# ----------------------------------------------------------------------------
# Deterministic parameter / input construction and test
# ----------------------------------------------------------------------------
def _init_params(key, dho, dhr, dmm):
    ks = jax.random.split(key, 12)
    def w(k, shape, fan_in):
        return (jax.random.normal(k, shape, jnp.float32) / np.sqrt(fan_in)).astype(jnp.float32)
    return {
        'w_ar2o_obj': w(ks[0], (dho, dmm), dho), 'b_ar2o_obj': w(ks[1], (1, dmm), dmm),
        'w_ar2o_reg': w(ks[2], (dhr, dmm), dhr), 'b_ar2o_reg': w(ks[3], (1, dmm), dmm),
        'w_tr2o':     w(ks[4], (dhr, dho), dhr), 'b_tr2o':     w(ks[5], (1, dho), dho),
        'w_ao2r_obj': w(ks[6], (dho, dmm), dho), 'b_ao2r_obj': w(ks[7], (1, dmm), dmm),
        'w_ao2r_reg': w(ks[8], (dhr, dmm), dhr), 'b_ao2r_reg': w(ks[9], (1, dmm), dmm),
        'w_to2r':     w(ks[10], (dho, dhr), dho), 'b_to2r':    w(ks[11], (1, dhr), dhr),
    }


if __name__ == "__main__":
    # opts: dim_ho=32, dim_hr=32, dim_mm=16, use_bias=True, dropout=0
    No, Nr, dho, dhr, dmm, H, W = 8, 4, 32, 32, 16, 16, 16

    key = jax.random.PRNGKey(0)
    k_obj, k_reg, k_mo, k_mr, k_par = jax.random.split(key, 5)

    feature_obj = jax.random.normal(k_obj, (No, dho), jnp.float32)
    feature_region = jax.random.normal(k_reg, (Nr, dhr, H, W), jnp.float32)

    # connectivity matrices; guarantee every row has at least one connection
    mat_object = (jax.random.uniform(k_mo, (No, Nr)) > 0.5).astype(jnp.float32)
    mat_object = mat_object.at[jnp.arange(No), jnp.arange(No) % Nr].set(1.0)
    mat_region = (jax.random.uniform(k_mr, (Nr, No)) > 0.5).astype(jnp.float32)
    mat_region = mat_region.at[jnp.arange(Nr), jnp.arange(Nr) % No].set(1.0)

    params = _init_params(k_par, dho, dhr, dmm)
    ref_obj, ref_reg = _ref_forward(feature_obj, feature_region,
                                    mat_object, mat_region, params)

    # float32 MXU-operand path, default tiling (Tp = H*W = 256, one pixel tile per region)
    out_obj, out_reg = factor_updating_structure_forward(
        feature_obj, feature_region, mat_object, mat_region, params,
        compute_dtype=jnp.float32)
    jax.block_until_ready((out_obj, out_reg))
    np.testing.assert_allclose(np.asarray(out_obj), ref_obj, rtol=5e-3, atol=5e-3)
    np.testing.assert_allclose(np.asarray(out_reg), ref_reg, rtol=5e-3, atol=5e-3)

    # bfloat16 MXU-operand path with 128-pixel tiles (2 tiles/region -> exercises the
    # multi-tile online softmax); looser tolerance for bf16 operands.
    out_obj_b, out_reg_b = factor_updating_structure_forward(
        feature_obj, feature_region, mat_object, mat_region, params,
        compute_dtype=jnp.bfloat16, tile_pixels=128)
    jax.block_until_ready((out_obj_b, out_reg_b))
    np.testing.assert_allclose(np.asarray(out_obj_b), ref_obj, rtol=8e-2, atol=8e-2)
    np.testing.assert_allclose(np.asarray(out_reg_b), ref_reg, rtol=8e-2, atol=8e-2)

    print("KERNEL_OK")
</pallas_src>

<mosaic_0001>
module attributes {stable_mosaic.version = 11 : i64} {
  func.func @_r2o_kernel(%arg0: i32, %arg1: i32, %arg2: memref<8x32xf32, #tpu.memory_space<vmem>>, %arg3: memref<8x1xf32, #tpu.memory_space<vmem>>, %arg4: memref<8x4xf32, #tpu.memory_space<vmem>>, %arg5: memref<1x32x256xf32, #tpu.memory_space<vmem>>, %arg6: memref<8x32xf32, #tpu.memory_space<vmem>>, %arg7: memref<32x32xf32, #tpu.memory_space<vmem>>, %arg8: memref<1x32xf32, #tpu.memory_space<vmem>>, %arg9: memref<8x32xf32, #tpu.memory_space<vmem>>, %arg10: memref<8x1xf32, #tpu.memory_space<vmem>>, %arg11: memref<8x1xf32, #tpu.memory_space<vmem>>, %arg12: memref<8x32xf32, #tpu.memory_space<vmem>>) attributes {dimension_semantics = [#tpu.dimension_semantics<arbitrary>, #tpu.dimension_semantics<arbitrary>], iteration_bounds = array<i64: 4, 1>, scalar_prefetch = 0 : i64, scratch_operands = 3 : i64, tpu.core_type = #tpu.core_type<tc>, window_params = [{pipeline_mode = #tpu.pipeline_mode<synchronous>, transform_indices = @transform_0, window_bounds = array<i64: 8, 32>}, {pipeline_mode = #tpu.pipeline_mode<synchronous>, transform_indices = @transform_1, window_bounds = array<i64: 8, 1>}, {pipeline_mode = #tpu.pipeline_mode<synchronous>, transform_indices = @transform_2, window_bounds = array<i64: 8, 4>}, {transform_indices = @transform_3, window_bounds = array<i64: 1, 32, 256>}, {pipeline_mode = #tpu.pipeline_mode<synchronous>, transform_indices = @transform_4, window_bounds = array<i64: 8, 32>}, {pipeline_mode = #tpu.pipeline_mode<synchronous>, transform_indices = @transform_5, window_bounds = array<i64: 32, 32>}, {pipeline_mode = #tpu.pipeline_mode<synchronous>, transform_indices = @transform_6, window_bounds = array<i64: 1, 32>}, {pipeline_mode = #tpu.pipeline_mode<synchronous>, transform_indices = @transform_7, window_bounds = array<i64: 8, 32>}]} {
    %c0_i32 = arith.constant 0 : i32
    %0 = arith.cmpi eq, %arg0, %c0_i32 : i32
    %c0_i32_0 = arith.constant 0 : i32
    %1 = arith.cmpi eq, %arg1, %c0_i32_0 : i32
    %2 = arith.andi %0, %1 : i1
    %3 = arith.extui %2 : i1 to i32
    %cst = arith.constant -1.000000e+30 : f32
    %c0_i32_1 = arith.constant 0 : i32
    %4 = arith.cmpi ne, %3, %c0_i32_1 : i32
    scf.if %4 {
      %60 = vector.broadcast %cst : f32 to vector<8x1xf32>
      %c0_36 = arith.constant 0 : index
      %c0_37 = arith.constant 0 : index
      %61 = vector.load %arg10[%c0_36, %c0_37] : memref<8x1xf32, #tpu.memory_space<vmem>>, vector<8x1xf32>
      tpu.vector_store %arg10[%c0_36, %c0_37], %60 {strides = array<i32>} : memref<8x1xf32, #tpu.memory_space<vmem>>, vector<8x1xf32>,
      %cst_38 = arith.constant 0.000000e+00 : f32
      %62 = vector.broadcast %cst_38 : f32 to vector<8x1xf32>
      %c0_39 = arith.constant 0 : index
      %c0_40 = arith.constant 0 : index
      %63 = vector.load %arg11[%c0_39, %c0_40] : memref<8x1xf32, #tpu.memory_space<vmem>>, vector<8x1xf32>
      tpu.vector_store %arg11[%c0_39, %c0_40], %62 {strides = array<i32>} : memref<8x1xf32, #tpu.memory_space<vmem>>, vector<8x1xf32>,
      %cst_41 = arith.constant 0.000000e+00 : f32
      %64 = vector.broadcast %cst_41 : f32 to vector<8x32xf32>
      %c0_42 = arith.constant 0 : index
      %c0_43 = arith.constant 0 : index
      %65 = vector.load %arg12[%c0_42, %c0_43] : memref<8x32xf32, #tpu.memory_space<vmem>>, vector<8x32xf32>
      tpu.vector_store %arg12[%c0_42, %c0_43], %64 {strides = array<i32>} : memref<8x32xf32, #tpu.memory_space<vmem>>, vector<8x32xf32>,
    } else {
    }
    %c0 = arith.constant 0 : index
    %c0_2 = arith.constant 0 : index
    %c0_3 = arith.constant 0 : index
    %5 = vector.load %arg5[%c0, %c0_2, %c0_3] : memref<1x32x256xf32, #tpu.memory_space<vmem>>, vector<1x32x256xf32>
    %6 = vector.shape_cast %5 : vector<1x32x256xf32> to vector<32x256xf32>
    %cst_4 = arith.constant 0.000000e+00 : f32
    %7 = vector.broadcast %cst_4 : f32 to vector<32x256xf32>
    %8 = arith.maximumf %6, %7 : vector<32x256xf32>
    %c0_5 = arith.constant 0 : index
    %c0_6 = arith.constant 0 : index
    %9 = vector.load %arg2[%c0_5, %c0_6] : memref<8x32xf32, #tpu.memory_space<vmem>>, vector<8x32xf32>
    %cst_7 = arith.constant dense<0.000000e+00> : vector<8x256xf32>
    %10 = tpu.matmul %9, %8, %cst_7 {dimension_numbers = #tpu.dot_dimension_numbers<[1], [0], [0], [1], [0, 0, 1, 1], [], []>} : vector<8x32xf32>, vector<32x256xf32>, vector<8x256xf32> -> vector<8x256xf32>
    %c0_8 = arith.constant 0 : index
    %c0_9 = arith.constant 0 : index
    %11 = vector.load %arg3[%c0_8, %c0_9] : memref<8x1xf32, #tpu.memory_space<vmem>>, vector<8x1xf32>
    %12 = vector.broadcast %11 : vector<8x1xf32> to vector<8x256xf32>
    %13 = arith.addf %10, %12 : vector<8x256xf32>
    %14 = tpu.iota {dimensions = array<i32: 1>} : vector<8x4xi32>
    %15 = vector.broadcast %arg0 : i32 to vector<8x4xi32>
    %16 = arith.cmpi eq, %14, %15 : vector<8x4xi32>
    %c0_10 = arith.constant 0 : index
    %c0_11 = arith.constant 0 : index
    %17 = vector.load %arg4[%c0_10, %c0_11] : memref<8x4xf32, #tpu.memory_space<vmem>>, vector<8x4xf32>
    %cst_12 = arith.constant 0.000000e+00 : f32
    %18 = vector.broadcast %cst_12 : f32 to vector<8x4xf32>
    %19 = arith.select %16, %17, %18 : vector<8x4xi1>, vector<8x4xf32>
    %cst_13 = arith.constant dense<0.000000e+00> : vector<8xf32>
    %20 = vector.multi_reduction <add>, %19, %cst_13 [1] : vector<8x4xf32> to vector<8xf32>
    %21 = vector.shape_cast %20 : vector<8xf32> to vector<8x1xf32>
    %cst_14 = arith.constant 5.000000e-01 : f32
    %22 = vector.broadcast %cst_14 : f32 to vector<8x1xf32>
    %23 = arith.cmpf ogt, %21, %22 : vector<8x1xf32>
    %cst_15 = arith.constant -1.000000e+30 : f32
    %24 = vector.shape_cast %23 : vector<8x1xi1> to vector<8x1xi1>
    %25 = vector.broadcast %24 : vector<8x1xi1> to vector<8x256xi1>
    %26 = vector.broadcast %cst_15 : f32 to vector<8x256xf32>
    %27 = arith.select %25, %13, %26 : vector<8x256xi1>, vector<8x256xf32>
    %c0_16 = arith.constant 0 : index
    %c0_17 = arith.constant 0 : index
    %28 = vector.load %arg10[%c0_16, %c0_17] : memref<8x1xf32, #tpu.memory_space<vmem>>, vector<8x1xf32>
    %cst_18 = arith.constant dense<0xFF800000> : vector<8xf32>
    %29 = vector.multi_reduction <maximumf>, %27, %cst_18 [1] : vector<8x256xf32> to vector<8xf32>
    %30 = vector.shape_cast %29 : vector<8xf32> to vector<8x1xf32>
    %31 = arith.maximumf %28, %30 : vector<8x1xf32>
    %c0_19 = arith.constant 0 : index
    %c0_20 = arith.constant 0 : index
    %32 = vector.load %arg10[%c0_19, %c0_20] : memref<8x1xf32, #tpu.memory_space<vmem>>, vector<8x1xf32>
    %33 = arith.subf %32, %31 : vector<8x1xf32>
    %34 = math.exp %33 : vector<8x1xf32>
    %35 = vector.broadcast %31 : vector<8x1xf32> to vector<8x256xf32>
    %36 = arith.subf %27, %35 : vector<8x256xf32>
    %37 = math.exp %36 : vector<8x256xf32>
    %cst_21 = arith.constant 0.000000e+00 : f32
    %38 = vector.shape_cast %23 : vector<8x1xi1> to vector<8x1xi1>
    %39 = vector.broadcast %38 : vector<8x1xi1> to vector<8x256xi1>
    %40 = vector.broadcast %cst_21 : f32 to vector<8x256xf32>
    %41 = arith.select %39, %37, %40 : vector<8x256xi1>, vector<8x256xf32>
    %c0_22 = arith.constant 0 : index
    %c0_23 = arith.constant 0 : index
    %42 = vector.load %arg11[%c0_22, %c0_23] : memref<8x1xf32, #tpu.memory_space<vmem>>, vector<8x1xf32>
    %43 = arith.mulf %34, %42 : vector<8x1xf32>
    %cst_24 = arith.constant dense<0.000000e+00> : vector<8xf32>
    %44 = vector.multi_reduction <add>, %41, %cst_24 [1] : vector<8x256xf32> to vector<8xf32>
    %45 = vector.shape_cast %44 : vector<8xf32> to vector<8x1xf32>
    %46 = arith.addf %43, %45 : vector<8x1xf32>
    %c0_25 = arith.constant 0 : index
    %c0_26 = arith.constant 0 : index
    %47 = vector.load %arg11[%c0_25, %c0_26] : memref<8x1xf32, #tpu.memory_space<vmem>>, vector<8x1xf32>
    tpu.vector_store %arg11[%c0_25, %c0_26], %46 {strides = array<i32>} : memref<8x1xf32, #tpu.memory_space<vmem>>, vector<8x1xf32>,
    %c0_27 = arith.constant 0 : index
    %c0_28 = arith.constant 0 : index
    %48 = vector.load %arg12[%c0_27, %c0_28] : memref<8x32xf32, #tpu.memory_space<vmem>>, vector<8x32xf32>
    %49 = vector.broadcast %34 : vector<8x1xf32> to vector<8x32xf32>
    %50 = arith.mulf %49, %48 : vector<8x32xf32>
    %cst_29 = arith.constant dense<0.000000e+00> : vector<8x32xf32>
    %51 = tpu.matmul %41, %6, %cst_29 {dimension_numbers = #tpu.dot_dimension_numbers<[1], [1], [0], [0], [0, 0, 1, 0], [], []>} : vector<8x256xf32>, vector<32x256xf32>, vector<8x32xf32> -> vector<8x32xf32>
    %52 = arith.addf %50, %51 : vector<8x32xf32>
    %c0_30 = arith.constant 0 : index
    %c0_31 = arith.constant 0 : index
    %53 = vector.load %arg12[%c0_30, %c0_31] : memref<8x32xf32, #tpu.memory_space<vmem>>, vector<8x32xf32>
    tpu.vector_store %arg12[%c0_30, %c0_31], %52 {strides = array<i32>} : memref<8x32xf32, #tpu.memory_space<vmem>>, vector<8x32xf32>,
    %c0_32 = arith.constant 0 : index
    %c0_33 = arith.constant 0 : index
    %54 = vector.load %arg10[%c0_32, %c0_33] : memref<8x1xf32, #tpu.memory_space<vmem>>, vector<8x1xf32>
    tpu.vector_store %arg10[%c0_32, %c0_33], %31 {strides = array<i32>} : memref<8x1xf32, #tpu.memory_space<vmem>>, vector<8x1xf32>,
    %c3_i32 = arith.constant 3 : i32
    %55 = arith.cmpi eq, %arg0, %c3_i32 : i32
    %c0_i32_34 = arith.constant 0 : i32
    %56 = arith.cmpi eq, %arg1, %c0_i32_34 : i32
    %57 = arith.andi %55, %56 : i1
    %58 = arith.extui %57 : i1 to i32
    %c0_i32_35 = arith.constant 0 : i32
    %59 = arith.cmpi ne, %58, %c0_i32_35 : i32
    scf.if %59 {
      %c0_36 = arith.constant 0 : index
      %c0_37 = arith.constant 0 : index
      %60 = vector.load %arg12[%c0_36, %c0_37] : memref<8x32xf32, #tpu.memory_space<vmem>>, vector<8x32xf32>
      %c0_38 = arith.constant 0 : index
      %c0_39 = arith.constant 0 : index
      %61 = vector.load %arg11[%c0_38, %c0_39] : memref<8x1xf32, #tpu.memory_space<vmem>>, vector<8x1xf32>
      %cst_40 = arith.constant 1.000000e-30 : f32
      %62 = vector.broadcast %cst_40 : f32 to vector<8x1xf32>
      %63 = arith.maximumf %61, %62 : vector<8x1xf32>
      %64 = vector.broadcast %63 : vector<8x1xf32> to vector<8x32xf32>
      %65 = arith.divf %60, %64 : vector<8x32xf32>
      %cst_41 = arith.constant 0.000000e+00 : f32
      %66 = vector.broadcast %cst_41 : f32 to vector<8x32xf32>
      %67 = arith.maximumf %65, %66 : vector<8x32xf32>
      %c0_42 = arith.constant 0 : index
      %c0_43 = arith.constant 0 : index
      %68 = vector.load %arg7[%c0_42, %c0_43] : memref<32x32xf32, #tpu.memory_space<vmem>>, vector<32x32xf32>
      %cst_44 = arith.constant dense<0.000000e+00> : vector<8x32xf32>
      %69 = tpu.matmul %67, %68, %cst_44 {dimension_numbers = #tpu.dot_dimension_numbers<[1], [0], [0], [1], [0, 0, 1, 1], [], []>} : vector<8x32xf32>, vector<32x32xf32>, vector<8x32xf32> -> vector<8x32xf32>
      %c0_45 = arith.constant 0 : index
      %c0_46 = arith.constant 0 : index
      %70 = vector.load %arg8[%c0_45, %c0_46] : memref<1x32xf32, #tpu.memory_space<vmem>>, vector<1x32xf32>
      %71 = vector.broadcast %70 : vector<1x32xf32> to vector<8x32xf32>
      %72 = arith.addf %69, %71 : vector<8x32xf32>
      %c0_47 = arith.constant 0 : index
      %c0_48 = arith.constant 0 : index
      %73 = vector.load %arg6[%c0_47, %c0_48] : memref<8x32xf32, #tpu.memory_space<vmem>>, vector<8x32xf32>
      %74 = arith.addf %73, %72 : vector<8x32xf32>
      %c0_49 = arith.constant 0 : index
      %c0_50 = arith.constant 0 : index
      %75 = vector.load %arg9[%c0_49, %c0_50] : memref<8x32xf32, #tpu.memory_space<vmem>>, vector<8x32xf32>
      tpu.vector_store %arg9[%c0_49, %c0_50], %74 {strides = array<i32>} : memref<8x32xf32, #tpu.memory_space<vmem>>, vector<8x32xf32>,
    } else {
    }
    return
  }
  func.func @transform_0(%arg0: i32, %arg1: i32) -> (i32, i32) {
    %c0_i32 = arith.constant 0 : i32
    %c0_i32_0 = arith.constant 0 : i32
    %c0_i32_1 = arith.constant 0 : i32
    return %c0_i32, %c0_i32_0 : i32, i32
  }
  func.func @transform_1(%arg0: i32, %arg1: i32) -> (i32, i32) {
    %c0_i32 = arith.constant 0 : i32
    %c0_i32_0 = arith.constant 0 : i32
    %c0_i32_1 = arith.constant 0 : i32
    return %c0_i32, %c0_i32_0 : i32, i32
  }
  func.func @transform_2(%arg0: i32, %arg1: i32) -> (i32, i32) {
    %c0_i32 = arith.constant 0 : i32
    %c0_i32_0 = arith.constant 0 : i32
    %c0_i32_1 = arith.constant 0 : i32
    return %c0_i32, %c0_i32_0 : i32, i32
  }
  func.func @transform_3(%arg0: i32, %arg1: i32) -> (i32, i32, i32) {
    %c0_i32 = arith.constant 0 : i32
    %c0_i32_0 = arith.constant 0 : i32
    return %arg0, %c0_i32, %arg1 : i32, i32, i32
  }
  func.func @transform_4(%arg0: i32, %arg1: i32) -> (i32, i32) {
    %c0_i32 = arith.constant 0 : i32
    %c0_i32_0 = arith.constant 0 : i32
    %c0_i32_1 = arith.constant 0 : i32
    return %c0_i32, %c0_i32_0 : i32, i32
  }
  func.func @transform_5(%arg0: i32, %arg1: i32) -> (i32, i32) {
    %c0_i32 = arith.constant 0 : i32
    %c0_i32_0 = arith.constant 0 : i32
    %c0_i32_1 = arith.constant 0 : i32
    return %c0_i32, %c0_i32_0 : i32, i32
  }
  func.func @transform_6(%arg0: i32, %arg1: i32) -> (i32, i32) {
    %c0_i32 = arith.constant 0 : i32
    %c0_i32_0 = arith.constant 0 : i32
    %c0_i32_1 = arith.constant 0 : i32
    return %c0_i32, %c0_i32_0 : i32, i32
  }
  func.func @transform_7(%arg0: i32, %arg1: i32) -> (i32, i32) {
    %c0_i32 = arith.constant 0 : i32
    %c0_i32_0 = arith.constant 0 : i32
    %c0_i32_1 = arith.constant 0 : i32
    return %c0_i32, %c0_i32_0 : i32, i32
  }
}

</mosaic_0001>

<bundles_post_ra>
// kernel: tpu_custom_call.1
= control target key start
LH: loop header
LB: loop body
LE: loop exit
PB: predicated region body
PF: predicated region fallthrough
CT: control target
= control target key end

     0   :  { %12 = vsyncpa [#allocation6], 0  ;;  %s1414_s0 = inlined_call_operand.hbm [shape: f32[8,32], index: 0, kind: input, shape index: {}]   ;;  %s1415_s1 = inlined_call_operand.vmem [shape: f32[8,1], index: 1, kind: input, shape index: {}]   ;;  %s1416_s2 = inlined_call_operand.vmem [shape: f32[8,4], index: 2, kind: input, shape index: {}]   ;;  %s1417_s3 = inlined_call_operand.hbm [shape: f32[4,32,256], index: 3, kind: input, shape index: {}]   ;;  %s1418_s4 = inlined_call_operand.hbm [shape: f32[8,32], index: 4, kind: input, shape index: {}]   ;;  %s1419_s5 = inlined_call_operand.vmem [shape: f32[32,32], index: 5, kind: input, shape index: {}]   ;;  %s1420_s6 = inlined_call_operand.vmem [shape: f32[1,32], index: 6, kind: input, shape index: {}]   ;;  %s1421_s7 = inlined_call_operand.hbm [shape: f32[8,32], index: 7, kind: output, shape index: {}]  }
   0x1   :  { %13 = vsyncpa [#allocation9], 0 }
   0x2   :  { %15 = vsyncpa [#allocation9 + $0x1], 0 }
   0x3   :  { %16 = vsyncpa [#allocation7], 0  ;;  %s1151_s24 = smov 0   ;;  %s1153_s25 = smov 0  }
   0x4   :  { %s1155_s26 = smov 0   ;;  %s1157_s27 = smov 0  }
   0x5   :  { %s1159_s28 = smov 0   ;;  %s1161_s29 = smov 0  }
   0x6 LB: > { %s1180_s30 = sadd.s32 4294967295, %s1095_s29   ;;  %s106_s8 = sadd.s32 1, %s1083_s26  ;;  %s1095_s29 = sphi %s1161_s29, %s22_s29   ;;  %s1091_s28 = sphi %s1159_s28, %s1442_s28   ;;  %s1087_s27 = sphi %s1157_s27, %s1441_s27   ;;  %s1083_s26 = sphi %s1155_s26, %s1440_s26   ;;  %s1079_s25 = sphi %s1153_s25, %s1439_s25   ;;  %s1075_s24 = sphi %s1151_s24, %s1438_s24  }
   0x7   : > { %p113_p0 = scmp.ne.s32.totalorder %s1083_s26, %s1079_s25  ;;  %p114_p1 = scmp.eq.s32.totalorder %s1095_s29, 0 }
   0x8   : > { %p119_p2 = scmp.ne.s32.totalorder %s1079_s25, %s1075_s24  ;;  %p1422_p3 = scmp.eq.s32.totalorder %s1180_s30, 0 }
   0x9   : > { %p115_p4 = por %p114_p1, %p113_p0  ;;  %p754_p5 = scmp.ge.s32.totalorder %s1095_s29, 1 }
   0xa   : > { %p1191_p6 = por %p1422_p3, %p119_p2  ;;  %p214_p7 = scmp.lt.s32.totalorder %s1095_s29, 5 }
   0xb   : > { %s1097_s11 = smov [#allocation10]   ;;  %p844_p10 = scmp.lt.s32.totalorder %s1095_s29, 4 }
   0xc   : > { %s1426_s9 = scalar_select %p1191_p6, 1, 0 }
   0xd   : > { %p1196_p8 = pnand %p754_p5, %p214_p7  ;;  %s244_s12 = sshll.u32 %s1097_s11, 4  ;;  %s245_s12 = int_to_ptr.vmem [resolvable:$true] %s244_s12 }
   0xe   : > { %p1209_p12 = pnand %p844_p10, %p115_p4  ;;  %s1098_s15 = smov [#allocation5]  }
   0xf   : > { %s1427_s10 = scalar_select %p1196_p8, 1, 0 }
  0x10   : > { %p831_p9 = pneg %p1196_p8  ;;  %s227_s16 = sshll.u32 %s1098_s15, 4  ;;  %s228_s16 = int_to_ptr.vmem [resolvable:$true] %s227_s16 }
  0x11   : > { %s1429_s14 = scalar_select %p1209_p12, 1, 0 }
  0x12   : > { %p1205_p11 = pnand %p831_p9, %p1422_p3  ;;  %s921_s19 = scalar_lea.hbm %s1418_s4, 128 }
  0x13   : > { %p922_p13 = scmp.ne.s32.totalorder %s1418_s4, %s921_s19  ;;  %p928_p4 = scmp.lt.u32.totalorder %s921_s19, %s1418_s4 }
  0x14   : > { %p923_p0 = pneg %p1205_p11 }
  0x16   : > { %p924_p1 = pnand %p923_p0, %p922_p13 }
  0x18   : > { %p925_p2 = pneg %p924_p1 }
  0x1a   : > { %p930_p5 = pnand %p928_p4, %p925_p2 }
  0x1c   : > { %933 = shalt.err (!%p930_p5)
}
  0x1d   : > { %s934_s24 = scalar_lea.vmem %s245_s12, 128  ;;  %p942_p3 = scmp.lt.s32.totalorder %s245_s12, %s245_s12 }
  0x1e   : > { %p935_p7 = scmp.ne.s32.totalorder %s245_s12, %s934_s24  ;;  %p943_p6 = scmp.lt.s32.totalorder %s934_s24, %s934_s24 }
  0x20   : > { %p937_p9 = pnand %p935_p7, %p923_p0  ;;  %p944_p8 = por %p943_p6, %p942_p3 }
  0x22   : > { %p938_p10 = pneg %p937_p9 }
  0x24   : > { %p945_p12 = pnand %p944_p8, %p938_p10 }
  0x26   : > { %948 = shalt.err (!%p945_p12)
}
  0x27   : > { %837 = dma.hbm_to_vmem [thread:$0]  (!%p1205_p11), %s1418_s4, 128, %s245_s12, [#allocation9]  }
  0x28   : > { %s949_s19 = scalar_lea.hbm %s1414_s0, 128 }
  0x29   : > { %p950_p13 = scmp.ne.s32.totalorder %s1414_s0, %s949_s19  ;;  %p956_p8 = scmp.lt.u32.totalorder %s949_s19, %s1414_s0 }
  0x2b   : > { %p952_p3 = pnand %p950_p13, %p923_p0 }
  0x2d   : > { %p953_p6 = pneg %p952_p3 }
  0x2f   : > { %p958_p12 = pnand %p956_p8, %p953_p6 }
  0x31   : > { %961 = shalt.err (!%p958_p12)
}
  0x32   : > { %s962_s12 = scalar_lea.vmem %s228_s16, 128  ;;  %p970_p5 = scmp.lt.s32.totalorder %s228_s16, %s228_s16 }
  0x33   : > { %p963_p1 = scmp.ne.s32.totalorder %s228_s16, %s962_s12  ;;  %p971_p7 = scmp.lt.s32.totalorder %s962_s12, %s962_s12 }
  0x35   : > { %p965_p2 = pnand %p963_p1, %p923_p0  ;;  %p972_p9 = por %p971_p7, %p970_p5 }
  0x37   : > { %p966_p4 = pneg %p965_p2 }
  0x39   : > { %p973_p10 = pnand %p972_p9, %p966_p4 }
  0x3b   : > { %976 = shalt.err (!%p973_p10)
}
  0x3c   : > { %834 = dma.hbm_to_vmem [thread:$0]  (!%p1205_p11), %s1414_s0, 128, %s228_s16, [#allocation6]  }
  0x3d   : > { %s261_s15 = sand.u32 1, %s1095_s29   ;;  %s34_s17 = sadd.s32 1, %s1091_s28 }
  0x3e   : > { %p36_p0 = scmp.ge.s32.totalorder %s34_s17, 4  ;;  %s263_s18 = sand.u32 1, %s1083_s26  }
  0x3f   : > { %s758_s19 = sshll.u32 %s263_s18, 6  ;;  %s776_s20 = sshll.u32 %s1091_s28, 10 }
  0x40   : > { %s1444_s17 = smov (%p36_p0, %s34_s17), 0  ;;  %s1264_s22 = scalar_lea.hbm %s1417_s3, %s776_s20 }
  0x41   : > { %s101_s16 = ssub.s32 %s1091_s28, %s1444_s17  ;;  %s265_s23 = scalar_lea.vmem [#allocation8], %s758_s19 }
  0x42   : > { %s274_s12 = sshll.u32 %s265_s23, 4  ;;  %p104_p11 = scmp.eq.s32.totalorder %s101_s16, 0  ;;  %s1268_s12 = int_to_ptr.vmem [resolvable:$true] %s274_s12 }
  0x43   : > { %s1275_s11 = scalar_lea.sflag [#allocation9], %s261_s15  ;;  %s977_s18 = scalar_lea.hbm %s1264_s22, 1024 }
  0x44   : > { %s1273_s24 = scalar_select %p104_p11, %s1083_s26, %s106_s8  }
  0x45   : > { %p978_p13 = scmp.ne.s32.totalorder %s1264_s22, %s977_s18  ;;  %p1430_p3 = scmp.ne.s32.totalorder %s1429_s14, 0 }
  0x46   : > { %s982_s19 = scalar_lea.hbm %s1417_s3, 4096  ;;  %p983_p1 = scmp.lt.u32.totalorder %s1264_s22, %s1417_s3 }
  0x47   : > { %p979_p6 = pneg %p1430_p3  ;;  %p984_p2 = scmp.lt.u32.totalorder %s982_s19, %s977_s18 }
  0x48   : > { %p986_p5 = scmp.lt.u32.totalorder %s977_s18, %s1264_s22 }
  0x49   : > { %p980_p8 = pnand %p979_p6, %p978_p13  ;;  %p985_p4 = por %p984_p2, %p983_p1 }
  0x4b   : > { %p981_p12 = pneg %p980_p8  ;;  %p987_p7 = por %p986_p5, %p985_p4 }
  0x4d   : > { %p988_p9 = pnand %p987_p7, %p981_p12 }
  0x4f   : > { %991 = shalt.err (!%p988_p9)
}
  0x50   : > { %s992_s8 = scalar_lea.vmem %s1268_s12, 1024  ;;  %s1099_s15 = smov [#allocation8]  }
  0x51   : > { %p993_p10 = scmp.ne.s32.totalorder %s1268_s12, %s992_s8  ;;  %s997_s23 = sshll.u32 %s1099_s15, 4  ;;  %s998_s23 = int_to_ptr.vmem [resolvable:$false] %s997_s23 }
  0x52   : > { %s999_s20 = scalar_lea.vmem %s998_s23, 2048  ;;  %p1000_p13 = scmp.lt.s32.totalorder %s1268_s12, %s998_s23 }
  0x53   : > { %p995_p0 = pnand %p993_p10, %p979_p6  ;;  %p1001_p8 = scmp.lt.s32.totalorder %s999_s20, %s992_s8 }
  0x55   : > { %p996_p11 = pneg %p995_p0  ;;  %p1002_p1 = por %p1001_p8, %p1000_p13 }
  0x57   : > { %p1003_p2 = pnand %p1002_p1, %p996_p11 }
  0x59   : > { %1006 = shalt.err (!%p1003_p2)
}
  0x5a   : > { %s1100_s18 = smov 256   ;;  %s1101_s13 = smov 16  }
  0x5b   : > { %841 = dma.hbm_to_vmem [thread:$0]  (!%p1430_p3), %s1264_s22, 1024, %s1268_s12, %s1275_s11, %s1100_s18, %s1100_s18, %s1101_s13  }
  0x5c   : > { %p1431_p6 = scmp.ne.s32.totalorder %s1427_s10, 0 }
  0x5d   : > { %p1432_p12 = scmp.eq.s32.totalorder (!%p1431_p6), %s1180_s30, 0 }
  0x5e   : > { %286 = sbr.rel (%p1431_p6) target bundleno = 1180 (0x49c), region = 48 }
  0x65   : > { %1058 = dma.done.wait (%p1432_p12), [#allocation6], 128   ;;  %p1433_p4 = pmov %p1432_p12 }
  0x66   : > { %s292_s19 = sand.u32 1, %s1180_s30   ;;  %s294_s21 = sand.u32 1, %s1079_s25  }
  0x67   : > { %1060 = vsyncadd (%p1433_p4), [#allocation6], 4294967168  ;;  %s763_s16 = sshll.u32 %s294_s21, 6  ;;  %s293_s8 = scalar_lea.sflag [#allocation9], %s292_s19 }
  0x68   : > { %s1311_s15 = scalar_lea.vmem [#allocation8], %s763_s16  ;;  %p1434_p5 = scmp.ne.s32.totalorder %s1426_s9, 0 }
  0x6a   : > { %1062 = dma.done.wait (%p1434_p5), %s293_s8, 1024  }
  0x6b   : > { %1064 = vsyncadd (%p1434_p5), %s293_s8, 4294966272  ;;  %p1435_p3 = pmov %p1433_p4 }
  0x6d   : > { %1066 = dma.done.wait (%p1435_p3), [#allocation9], 128   ;;  %p1436_p7 = pmov %p1435_p3 }
  0x6e   : > { %p327_p9 = scmp.eq.s32.totalorder %s1087_s27, 0 }
  0x6f   : > { %1068 = vsyncadd (%p1436_p7), [#allocation9], 4294967168  ;;  %vm333_vm0 = vcmask (%p327_p9), 7168   ;;  %vm336_vm1 = vcmask (%p327_p9), 261120   ;;  %v1102_v0 = vmov (%p327_p9), -1e+30  }
  0x70   : > { %332 = sbr.rel (!%p327_p9) target bundleno = 119 (0x77), region = 64  ;;  %334 = vst.msk [vmem:[#allocation2] sm:$0xff] (%p327_p9), %vm333_vm0, %v1102_v0  ;;  %v1103_v1 = vmov (%p327_p9), 0.0  }
  0x71   : > { %335 = vst.msk [vmem:[#allocation3] sm:$0xff] (%p327_p9), %vm333_vm0, %v1103_v1 }
  0x72   : > { %337 = vst.msk [vmem:[#allocation4] sm:$0xff] (%p327_p9), %vm336_vm1, %v1103_v1 }
  0x77 PF: > { %v1323_v2 = vld [vmem:[%s1311_s15 + $0x8] sm:$0xff]  ;;  %v341_v3 = vld [vmem:[%s1311_s15 + $0x18] sm:$0xff]  ;;  %v1327_v4 = vld [vmem:[%s1311_s15] sm:$0xff]  ;;  %v436_v5 = vlaneseq  ;;  %v1104_v12 = vmov 0.0   ;;  %v438_v18 = vstv %s1087_s27  ;;  %vm442_vm2 = vcmask 31744   ;;  %p560_p10 = scmp.eq.s32.totalorder %s1087_s27, 3 }
  0x78   : > { %v347_v6 = vmax.f32 %v1323_v2, 0.0  ;;  %v349_v7 = vmax.f32 %v341_v3, 0.0  ;;  %v340_v8 = vld [vmem:[%s1311_s15 + $0x10] sm:$0xff]  ;;  %v346_v9 = vmax.f32 %v1327_v4, 0.0  ;;  %v343_v10 = vld [vmem:[%s1311_s15 + $0x28] sm:$0xff]  ;;  %v345_v11 = vld [vmem:[%s1311_s15 + $0x38] sm:$0xff]  ;;  %429 = vmatprep.mubr.f32.mxu0 %v1104_v12  ;;  %v803_v44 = vpack.c.bf16 %v341_v3, %v1323_v2 }
  0x79   : > { %v348_v13 = vmax.f32 %v340_v8, 0.0  ;;  %v351_v14 = vmax.f32 %v343_v10, 0.0  ;;  %v353_v15 = vmax.f32 %v345_v11, 0.0  ;;  %v342_v16 = vld [vmem:[%s1311_s15 + $0x20] sm:$0xff]  ;;  %v344_v17 = vld [vmem:[%s1311_s15 + $0x30] sm:$0xff]  ;;  %v437_v22 = vand.u32 127, %v436_v5 }
  0x7a   : > { %v795_v19 = vpack.c.bf16 %v349_v7, %v347_v6  ;;  %v350_v20 = vmax.f32 %v342_v16, 0.0  ;;  %v352_v21 = vmax.f32 %v344_v17, 0.0  ;;  %v440_v23 = vld [vmem:[%s1416_s2] sm:$0xff]  ;;  %v1105_v26 = vmov 0   ;;  %v354_v30 = vld [vmem:[#allocation5] sm:$0xff]  ;;  %804 = vmatprep.subr.bf16.mxu1 %v803_v44  ;;  %v472_v61 = vld [vmem:[#allocation3] sm:$0xff] }
  0x7b   : > { %v797_v24 = vpack.c.bf16 %v348_v13, %v346_v9  ;;  %v799_v25 = vpack.c.bf16 %v353_v15, %v351_v14  ;;  %vm439_vm3 = vcmp.eq.s32.totalorder %v437_v22, %v438_v18  ;;  %910 = vset.pattern.permute.xlu0 %v1105_v26  ;;  %911 = vset.pattern.permute.xlu1 %v1105_v26  ;;  %vm361_vm4 = vcmask 261120   ;;  %v355_v31 = vld [vmem:[%s1415_s1] sm:$0xff]  ;;  %v480_v1 = vld [vmem:[#allocation4] sm:$0xff]  ;;  %v579_v15 = vld [vmem:[%s1419_s5 + $0x18] sm:$0xff] (%p560_p10) }
  0x7c   : > { %796 = vmatprep.subr.bf16.mxu0 %v795_v19  ;;  %v801_v27 = vpack.c.bf16 %v352_v21, %v350_v20  ;;  %v441_v28 = vsel %vm439_vm3, %v440_v23, 0.0  ;;  %v451_v41 = vld [vmem:[#allocation2] sm:$0xff]  ;;  %vm478_vm6 = vcmask 7168   ;;  %v805_v46 = vpack.c.bf16 %v340_v8, %v1327_v4  ;;  %v578_v12 = vld [vmem:[%s1419_s5 + $0x10] sm:$0xff] (%p560_p10) }
  0x7d   : > { %798 = vmatpush1.bf16.msra.mxu0 %v797_v24  ;;  %v443_v29 = vsel %vm442_vm2, %v441_v28, 0.0  ;;  %v807_v48 = vpack.c.bf16 %v345_v11, %v343_v10  ;;  %v809_v49 = vpack.c.bf16 %v344_v17, %v342_v16  ;;  %v1106_v8 = vmov (%p560_p10), 0   ;;  %v576_v10 = vld [vmem:[%s1419_s5] sm:$0xff] (%p560_p10)  ;;  %v577_v11 = vld [vmem:[%s1419_s5 + $0x8] sm:$0xff] (%p560_p10) }
  0x7e   : > { %800 = vmatprep.subr.bf16.mxu0 %v799_v25  ;;  %444 = vadd.xlane.f32.xlu0 %v443_v29  ;;  %v1107_v13 = vmov (%p560_p10), 0.0|0.0   ;;  %v812_v14 = vpack.c.bf16 (%p560_p10), %v577_v11, %v576_v10  ;;  %vm1108_vm7 = vmmov (%p560_p10), 0   ;;  %v1109_v16 = vmov (%p560_p10), 0.0   ;;  %v770_v23 = vld [vmem:[%s1420_s6] ss:$0 sm:$0xff] (%p560_p10) }
  0x7f   : > { %806 = vmatpush1.bf16.xpose.msra.mxu1 %v805_v46  ;;  %v815_v17 = vpack.c.bf16 (%p560_p10), %v579_v15, %v578_v12  ;;  %v660_v25 = vld [vmem:[#allocation10] sm:$0xff] (%p560_p10) }
  0x80   : > { %808 = vmatprep.subr.bf16.mxu1 %v807_v48 }
  0x81   : > { %802 = vmatpush1.bf16.msra.mxu0 %v801_v27 }
  0x82   : > { %811 = vmatprep.subr.bf16.mxu0 (%p560_p10), %v1107_v13 }
  0x84   : > { %766 = vmatmul.mubr.msk.f32.vlgmr.msra.gmra.mrb[0].mxu0 %vm361_vm4, %v354_v30 }
  0x85   : > { %792 = vmatprep.mubr.msk.f32.mxu0 (%p560_p10), %vm1108_vm7, %v1109_v16  ;;  %813 = vmatpush3.bf16.msra.mxu0 (%p560_p10), %v812_v14 }
  0x86   : > { %814 = vmatprep.subr.bf16.mxu0 (%p560_p10), %v1107_v13 }
  0x87   : > { %810 = vmatpush1.bf16.xpose.msra.mxu1 %v809_v49 }
  0x89   : > { %816 = vmatpush3.bf16.msra.mxu0 (%p560_p10), %v815_v17 }
  0x94   : > { %358 = vperm.xlu0 %910, %v355_v31  }
 0x10b   : > { %v445_v32 = vpop.xlane.xlu0 %444 }
 0x10c   : > { %vm446_vm5 = vcmp.gt.f32.partialorder %v445_v32, 0.5 }
 0x113   : > { %v359_v33 = vpop.permute.xlu0 %358 }
 0x157   : > { %v431_v34 = vpop.f32.mrb[0].mxu0 }
 0x158   : > { %v432_v35 = vadd.f32 %v431_v34, %v359_v33  ;;  %v433_v36 = vpop.f32.mrb[1].mxu0 }
 0x159   : > { %v434_v37 = vadd.f32 %v433_v36, %v359_v33 }
 0x15a   : > { %v449_v38 = vsel %vm446_vm5, %v432_v35, -1e+30 }
 0x15b   : > { %v450_v39 = vsel %vm446_vm5, %v434_v37, -1e+30 }
 0x15c   : > { %v452_v40 = vmax.f32 %v449_v38, %v450_v39 }
 0x15e   : > { %453 = vmax.xlane.f32.xlu1 %v452_v40 }
 0x1eb   : > { %v454_v42 = vpop.xlane.xlu1 %453 }
 0x1ec   : > { %v455_v43 = vmax.f32 %v451_v41, %v454_v42 }
 0x1ee   : > { %v456_v45 = vsub.f32 %v451_v41, %v455_v43  ;;  %559 = vst.msk [vmem:[#allocation2] sm:$0xff] %vm478_vm6, %v455_v43  ;;  %461 = vperm.xlu1 %911, %v455_v43  }
 0x1f0   : > { %v457_v47 = vmul.f32 1.442695, %v456_v45 }
 0x1f2   : > { %912 = vpow2.f32 %v457_v47 }
 0x1fc   : > { %v913_v50 = vpop.eup %912 }
 0x1fd   : > { %483 = vperm.xlu0 %910, %v913_v50   ;;  %v473_v62 = vmul.f32 %v913_v50, %v472_v61 }
 0x201   : > { %918 = vset.pattern.permute.xlu0 (%p560_p10), %v1106_v8 }
 0x26d   : > { %v462_v51 = vpop.permute.xlu1 %461 }
 0x26e   : > { %v464_v52 = vsub.f32 %v449_v38, %v462_v51  ;;  %v465_v53 = vsub.f32 %v450_v39, %v462_v51 }
 0x270   : > { %v466_v54 = vmul.f32 1.442695, %v464_v52  ;;  %v468_v55 = vmul.f32 1.442695, %v465_v53 }
 0x272   : > { %914 = vpow2.f32 %v466_v54 }
 0x273   : > { %916 = vpow2.f32 %v468_v55 }
 0x27c   : > { %v915_v56 = vpop.eup %914  ;;  %v484_v2 = vpop.permute.xlu0 %483 }
 0x27d   : > { %v917_v57 = vpop.eup %916  ;;  %v470_v58 = vsel %vm446_vm5, %v915_v56, 0.0  ;;  %v486_v3 = vmul.f32 %v484_v2, %v480_v1 }
 0x27e   : > { %767 = vmatprep.mubr.msk.f32.mxu1 %vm446_vm5, %v917_v57  ;;  %v471_v59 = vsel %vm446_vm5, %v917_v57, 0.0 }
 0x27f   : > { %768 = vmatmul.mubr.msk.f32.vlgmr.msra.gmra.mrb[0].mxu1 %vm446_vm5, %v915_v56  ;;  %v474_v60 = vadd.f32 %v471_v59, %v470_v58 }
 0x281   : > { %475 = vadd.xlane.f32.xlu1 %v474_v60 }
 0x30e   : > { %v476_v63 = vpop.xlane.xlu1 %475 }
 0x30f   : > { %v477_v0 = vadd.f32 %v476_v63, %v473_v62 }
 0x311   : > { %479 = vst.msk [vmem:[#allocation3] sm:$0xff] %vm478_vm6, %v477_v0 }
 0x318   : > { %v566_v7 = vld [vmem:[#allocation3] sm:$0xff] (%p560_p10) }
 0x319   : > { %v567_v9 = vmax.f32 (%p560_p10), %v566_v7, 1e-30 }
 0x31b   : > { %570 = vperm.xlu0 (%p560_p10), %918, %v567_v9  }
 0x34f   : > { %564 = sbr.rel (!%p560_p10) target bundleno = 1155 (0x483), region = 68 }
 0x352   : > { %v553_v4 = vpop.f32.mrb[0].mxu1 }
 0x353   : > { %v557_v5 = vadd.f32 %v553_v4, %v486_v3  ;;  %v555_v6 = vpop.f32.mrb[1].mxu1 }
 0x355   : > { %558 = vst.msk [vmem:[#allocation4] sm:$0xff] %vm361_vm4, %v557_v5 }
 0x35c   : > { %v565_v19 = vld [vmem:[#allocation4] sm:$0xff] }
 0x39a   : > { %v571_v18 = vpop.permute.xlu0 %570 }
 0x39b   : > { %919 = vrcp.f32 %v571_v18 }
 0x3a5   : > { %v920_v20 = vpop.eup %919 }
 0x3a6   : > { %v574_v21 = vmul.f32 %v920_v20, %v565_v19 }
 0x3a8   : > { %v575_v22 = vmax.f32 %v574_v21, 0.0 }
 0x3aa   : > { %793 = vmatmul.mubr.msk.f32.vlgmr.msra.gmra.mrb[0].mxu0 %vm361_vm4, %v575_v22 }
 0x47d   : > { %v656_v24 = vpop.f32.mrb[0].mxu0 }
 0x47e   : > { %v657_v26 = vadd.f32 %v770_v23, %v656_v24  ;;  %v794_v27 = vpop.f32.mrb[1].mxu0 }
 0x480   : > { %v661_v28 = vadd.f32 %v660_v25, %v657_v26 }
 0x482   : > { %662 = vst.msk [vmem:[#allocation11] sm:$0xff] %vm361_vm4, %v661_v28 }
 0x483 PF: > { %p847_p0 = scmp.eq.s32.totalorder %s1180_s30, 3  ;;  %s1110_s8 = smov [#allocation11]  }
 0x484   : > { %s670_s15 = sshll.u32 %s1110_s8, 4  ;;  %s671_s15 = int_to_ptr.vmem [resolvable:$true] %s670_s15 }
 0x485   : > { %s1007_s9 = scalar_lea.vmem %s671_s15, 128  ;;  %p1014_p1 = scmp.lt.s32.totalorder %s671_s15, %s671_s15 }
 0x486   : > { %p1008_p11 = scmp.ne.s32.totalorder %s671_s15, %s1007_s9  ;;  %p1015_p2 = scmp.lt.s32.totalorder %s1007_s9, %s1007_s9 }
 0x488   : > { %p1009_p13 = pnand %p1008_p11, %p847_p0  ;;  %p1016_p6 = por %p1015_p2, %p1014_p1 }
 0x48a   : > { %p1010_p8 = pneg %p1009_p13 }
 0x48c   : > { %p1017_p12 = pnand %p1016_p6, %p1010_p8 }
 0x48e   : > { %1020 = shalt.err (!%p1017_p12)
}
 0x48f   : > { %s1021_s22 = scalar_lea.hbm %s1421_s7, 128 }
 0x490   : > { %p1022_p4 = scmp.ne.s32.totalorder %s1421_s7, %s1021_s22  ;;  %p1027_p7 = scmp.lt.u32.totalorder %s1021_s22, %s1421_s7 }
 0x492   : > { %p1023_p5 = pnand %p1022_p4, %p847_p0 }
 0x494   : > { %p1024_p3 = pneg %p1023_p5 }
 0x496   : > { %p1029_p9 = pnand %p1027_p7, %p1024_p3 }
 0x498   : > { %1032 = shalt.err (!%p1029_p9)
}
 0x499   : > { %828 = dma.vmem_to_hbm [thread:$0]  (%p847_p0), %s671_s15, 128, %s1421_s7, [#allocation7]  }
 0x49a   : > { %1070 = dma.done.wait (%p847_p0), [#allocation7], 128  }
 0x49b   : > { %1072 = vsyncadd (%p847_p0), [#allocation7], 4294967168 }
 0x49c PF: > { %s22_s29 = sadd.s32 1, %s1095_s29   ;;  %s1437_s13 = smov %s1273_s24 }
 0x49d   : > { %p19_p10 = scmp.ge.s32.totalorder %s22_s29, 6   ;;  %s1438_s24 = smov %s1079_s25 }
 0x49e   : > { %s1439_s25 = smov %s1083_s26  ;;  %s1440_s26 = smov %s1437_s13 }
 0x49f   : > { %s1441_s27 = smov %s1091_s28  ;;  %s1442_s28 = smov %s1444_s17 }
 0x4a0   :  { %21 = sbr.rel (!%p19_p10) target bundleno = 6 (0x6), region = 102 }
 0x4a7   :  { %683 = vsyncpa [#allocation6], 1 }
 0x4a8   :  { %685 = vsyncpa [#allocation6 + $0x1], 1 }
 0x4a9   :  { %686 = vsyncpa [#allocation9], 1 }
 0x4aa   :  { %688 = vsyncpa [#allocation9 + $0x1], 1 }
 0x4ab   :  { %689 = vsyncpa [#allocation7], 1 }
 0x4ac   :  { %691 = vsyncpa [#allocation7 + $0x1], 1 }

</bundles_post_ra>
